<compile_context>
chip_gen: v7x
topology: tpu7x:2x2x1
jax: 0.10.0
libtpu: 0.0.40
codegen_flags: <defaults>
</compile_context>

<pallas_src>
import functools

import jax
import jax.numpy as jnp
from jax.experimental import pallas as pl
from jax.experimental.pallas import tpu as pltpu

EPS = 1e-5
# Modest scoped-VMEM budget for the toy shapes; raise / sweep per chip for real
# shapes (v6e: up to ~100 MiB of 128 MiB physical; v7x: keep well under 64 MiB).
VMEM_LIMIT_BYTES = 32 * 1024 * 1024


# ----------------------------- in-kernel helpers -----------------------------

def _accum_stats(stats_ref, t):
    """Accumulate per-channel sum / sum-of-squares over the lane (H*W) axis."""
    stats_ref[0] += jnp.sum(t, axis=-1, keepdims=True)
    stats_ref[1] += jnp.sum(t * t, axis=-1, keepdims=True)


def _bn(t, stats_ref, gamma_ref, beta_ref, inv_count):
    """Training-mode BatchNorm using precomputed (sum, sumsq) over N*H*W."""
    mean = stats_ref[0] * inv_count                       # (C, 1) f32
    var = stats_ref[1] * inv_count - mean * mean          # biased variance
    scale = jax.lax.rsqrt(var + EPS) * gamma_ref[...]
    return (t - mean) * scale + beta_ref[...]


def _conv3x3(r, w2_ref, mask_ref, ws):
    """3x3 'same' conv on a per-image (F, H*W) activation as ONE MXU matmul.

    The 9 taps are lane shifts of d = dy*W + dx on the flattened (h, w) axis;
    out-of-image source pixels are zeroed by the precomputed (9, H*W) masks.
    Taps are concatenated along the contraction axis -> (9F, H*W), matched by
    the (F, 9F) reshaped weight.
    """
    m = r.shape[-1]
    taps = []
    k = 0
    for dy in (-1, 0, 1):
        for dx in (-1, 0, 1):
            d = dy * ws + dx
            sh = r if d == 0 else pltpu.roll(r, shift=(-d) % m, axis=1)
            if d != 0:
                sh = sh * mask_ref[k:k + 1, :]
            taps.append(sh)
            k += 1
    # TODO(synk): at real F, stage the concatenated taps in bf16 from the start
    #             to halve the (9F, TM) staging buffer (matters on v7x VMEM).
    big = jnp.concatenate(taps, axis=0).astype(jnp.bfloat16)   # (9F, H*W)
    return jnp.dot(w2_ref[...], big, preferred_element_type=jnp.float32)


# ------------------------------- stats kernel --------------------------------
# grid = (3 phases, N images); phase axis OUTER so each BN's statistics are
# complete over the whole batch before any later stage consumes them.
#   p=0: stats of conv1(x) and shortcut_conv(x)
#   p=1: stats of conv3x3(relu(bn1(conv1(x))))
#   p=2: stats of conv3(relu(bn2(...)))
# The four stats outputs use constant-index BlockSpecs -> VMEM-resident
# accumulators, flushed once at the end.

def _stats_kernel(x_ref, w1_ref, w2_ref, w3_ref, wsc_ref,
                  g1_ref, b1_ref, g2_ref, b2_ref, mask_ref,
                  s1_ref, s2_ref, s3_ref, ssc_ref,
                  *, ws, inv_count):
    p = pl.program_id(0)
    n = pl.program_id(1)

    @pl.when(jnp.logical_and(p == 0, n == 0))
    def _():
        s1_ref[...] = jnp.zeros_like(s1_ref)
        s2_ref[...] = jnp.zeros_like(s2_ref)
        s3_ref[...] = jnp.zeros_like(s3_ref)
        ssc_ref[...] = jnp.zeros_like(ssc_ref)

    x = x_ref[...]                                               # (Cin, HW) bf16
    t1 = jnp.dot(w1_ref[...], x, preferred_element_type=jnp.float32)  # (F, HW)

    @pl.when(p == 0)
    def _():
        _accum_stats(s1_ref, t1)
        tsc = jnp.dot(wsc_ref[...], x, preferred_element_type=jnp.float32)
        _accum_stats(ssc_ref, tsc)

    @pl.when(p >= 1)
    def _():
        r1 = jnp.maximum(_bn(t1, s1_ref, g1_ref, b1_ref, inv_count), 0.0)
        t2 = _conv3x3(r1, w2_ref, mask_ref, ws)

        @pl.when(p == 1)
        def _():
            _accum_stats(s2_ref, t2)

        @pl.when(p == 2)
        def _():
            r2 = jnp.maximum(_bn(t2, s2_ref, g2_ref, b2_ref, inv_count), 0.0)
            t3 = jnp.dot(w3_ref[...], r2.astype(jnp.bfloat16),
                         preferred_element_type=jnp.float32)
            _accum_stats(s3_ref, t3)


# ------------------------------- apply kernel --------------------------------
# grid = (N,), fully parallel (stats are plain inputs). One image per step; all
# intermediates stay in VMEM/vregs; lane-dense (4F, H*W) output store.

def _apply_kernel(x_ref, w1_ref, w2_ref, w3_ref, wsc_ref,
                  g1_ref, b1_ref, g2_ref, b2_ref,
                  g3_ref, b3_ref, gsc_ref, bsc_ref, mask_ref,
                  s1_ref, s2_ref, s3_ref, ssc_ref,
                  o_ref, *, ws, inv_count):
    x = x_ref[...]                                               # (Cin, HW) bf16

    t1 = jnp.dot(w1_ref[...], x, preferred_element_type=jnp.float32)
    r1 = jnp.maximum(_bn(t1, s1_ref, g1_ref, b1_ref, inv_count), 0.0)

    t2 = _conv3x3(r1, w2_ref, mask_ref, ws)
    r2 = jnp.maximum(_bn(t2, s2_ref, g2_ref, b2_ref, inv_count), 0.0)

    t3 = jnp.dot(w3_ref[...], r2.astype(jnp.bfloat16),
                 preferred_element_type=jnp.float32)
    y3 = _bn(t3, s3_ref, g3_ref, b3_ref, inv_count)

    tsc = jnp.dot(wsc_ref[...], x, preferred_element_type=jnp.float32)
    ysc = _bn(tsc, ssc_ref, gsc_ref, bsc_ref, inv_count)

    o_ref[...] = jnp.maximum(y3 + ysc, 0.0).astype(o_ref.dtype)


# --------------------------------- wrapper -----------------------------------

def bottleneck_2d_forward(x_nchw, params, stride=1):
    """Forward pass of bottlneck_2d (block=0: projection shortcut)."""
    N, cin, H, W = x_nchw.shape
    f = params['w1'].shape[0]
    f4 = 4 * f

    # The module puts the stride on conv1 / shortcut (1x1), so a subsample first
    # is exact.  TODO(synk): fold this into the BlockSpec index_map for stride>1.
    xs = x_nchw[:, :, ::stride, ::stride] if stride != 1 else x_nchw
    hs, ws = xs.shape[2], xs.shape[3]
    hw = hs * ws
    assert hw % 128 == 0, "per-image lane extent must be a multiple of 128"

    # Zero-copy (N, C, H*W) view; channels -> sublanes, H*W -> lanes. bf16 once.
    x_b = xs.reshape(N, cin, hw).astype(jnp.bfloat16)

    # Kernel-format weights: bf16 MXU operands; 3x3 weight flattened to (F, 9F)
    # with tap order k = ky*3 + kx matching the in-kernel tap concatenation.
    w1 = params['w1'].astype(jnp.bfloat16)                                  # (F, Cin)
    w2 = jnp.transpose(params['w2'], (0, 2, 3, 1)).reshape(f, 9 * f).astype(jnp.bfloat16)
    w3 = params['w3'].astype(jnp.bfloat16)                                  # (4F, F)
    wsc = params['wsc'].astype(jnp.bfloat16)                                # (4F, Cin)

    # Precomputed zero-padding masks for the 9 lane-shifted taps: (9, H*W).
    hh, ww = jnp.divmod(jnp.arange(hw, dtype=jnp.int32), ws)
    rows = []
    for dy in (-1, 0, 1):
        for dx in (-1, 0, 1):
            rows.append((hh + dy >= 0) & (hh + dy < hs) &
                        (ww + dx >= 0) & (ww + dx < ws))
    masks = jnp.stack(rows, axis=0).astype(jnp.float32)                     # (9, HW)

    inv_count = 1.0 / float(N * hw)

    def fixed(shape, naxes):
        zeros = (0,) * len(shape)
        if naxes == 2:
            return pl.BlockSpec(shape, lambda p, n: zeros)
        return pl.BlockSpec(shape, lambda n: zeros)

    # ---------------- pass 1: BN statistics (sequential, multi-phase) --------
    stats_shapes = (jax.ShapeDtypeStruct((2, f, 1), jnp.float32),
                    jax.ShapeDtypeStruct((2, f, 1), jnp.float32),
                    jax.ShapeDtypeStruct((2, f4, 1), jnp.float32),
                    jax.ShapeDtypeStruct((2, f4, 1), jnp.float32))
    s1, s2, s3, ssc = pl.pallas_call(
        functools.partial(_stats_kernel, ws=ws, inv_count=inv_count),
        grid=(3, N),
        out_shape=stats_shapes,
        in_specs=[
            pl.BlockSpec((pl.Squeezed(), cin, hw), lambda p, n: (n, 0, 0)),
            fixed(w1.shape, 2), fixed(w2.shape, 2), fixed(w3.shape, 2),
            fixed(wsc.shape, 2),
            fixed(params['g1'].shape, 2), fixed(params['b1'].shape, 2),
            fixed(params['g2'].shape, 2), fixed(params['b2'].shape, 2),
            fixed(masks.shape, 2),
        ],
        out_specs=tuple(fixed(s.shape, 2) for s in stats_shapes),
        compiler_params=pltpu.CompilerParams(
            dimension_semantics=("arbitrary", "arbitrary"),
            vmem_limit_bytes=VMEM_LIMIT_BYTES),
    )(x_b, w1, w2, w3, wsc,
      params['g1'], params['b1'], params['g2'], params['b2'], masks)

    # ---------------- pass 2: fused forward, one image per grid step ---------
    y = pl.pallas_call(
        functools.partial(_apply_kernel, ws=ws, inv_count=inv_count),
        grid=(N,),
        out_shape=jax.ShapeDtypeStruct((N, f4, hw), jnp.float32),
        in_specs=[
            pl.BlockSpec((pl.Squeezed(), cin, hw), lambda n: (n, 0, 0)),
            fixed(w1.shape, 1), fixed(w2.shape, 1), fixed(w3.shape, 1),
            fixed(wsc.shape, 1),
            fixed(params['g1'].shape, 1), fixed(params['b1'].shape, 1),
            fixed(params['g2'].shape, 1), fixed(params['b2'].shape, 1),
            fixed(params['g3'].shape, 1), fixed(params['b3'].shape, 1),
            fixed(params['gsc'].shape, 1), fixed(params['bsc'].shape, 1),
            fixed(masks.shape, 1),
            fixed(s1.shape, 1), fixed(s2.shape, 1),
            fixed(s3.shape, 1), fixed(ssc.shape, 1),
        ],
        out_specs=pl.BlockSpec((pl.Squeezed(), f4, hw), lambda n: (n, 0, 0)),
        compiler_params=pltpu.CompilerParams(
            dimension_semantics=("parallel",),       # megacore on v7x
            vmem_limit_bytes=VMEM_LIMIT_BYTES),
    )(x_b, w1, w2, w3, wsc,
      params['g1'], params['b1'], params['g2'], params['b2'],
      params['g3'], params['b3'], params['gsc'], params['bsc'],
      masks, s1, s2, s3, ssc)

    return y.reshape(N, f4, hs, ws)


# ----------------------------- params / reference ----------------------------

def init_params(key, in_channel, filters):
    """Deterministic synthetic parameters (shapes follow the PyTorch module)."""
    ks = jax.random.split(key, 12)
    f4 = filters * 4

    def w(k, shape):
        return 0.1 * jax.random.normal(k, shape, jnp.float32)

    def bn(kg, kb, c):
        gamma = 1.0 + 0.1 * jax.random.normal(kg, (c, 1), jnp.float32)
        beta = 0.05 * jax.random.normal(kb, (c, 1), jnp.float32)
        return gamma, beta

    w1 = w(ks[0], (filters, in_channel))             # conv1 1x1 (out, in)
    g1, b1 = bn(ks[1], ks[2], filters)
    w2 = w(ks[3], (filters, filters, 3, 3))          # conv2 3x3, torch layout
    g2, b2 = bn(ks[4], ks[5], filters)
    w3 = w(ks[6], (f4, filters))                     # conv3 1x1
    g3, b3 = bn(ks[7], ks[8], f4)
    wsc = w(ks[9], (f4, in_channel))                 # shortcut conv 1x1
    gsc, bsc = bn(ks[10], ks[11], f4)
    return dict(w1=w1, g1=g1, b1=b1, w2=w2, g2=g2, b2=b2,
                w3=w3, g3=g3, b3=b3, wsc=wsc, gsc=gsc, bsc=bsc)


def reference_forward(x_nchw, params, stride=1, matmul_dtype=jnp.float32):
    """Pure-JAX reference (NCHW). matmul_dtype=bf16 reproduces the kernel's MXU
    operand precision (apples-to-apples structural check); f32 is full-precision
    module semantics."""
    prec = (jax.lax.Precision.HIGHEST if matmul_dtype == jnp.float32
            else jax.lax.Precision.DEFAULT)
    x = x_nchw[:, :, ::stride, ::stride] if stride != 1 else x_nchw
    N, _, hs, ws = x.shape

    def mm(wmat, a):
        return jnp.einsum('oi,nihw->nohw',
                          wmat.astype(matmul_dtype), a.astype(matmul_dtype),
                          precision=prec, preferred_element_type=jnp.float32)

    def bn(t, gamma, beta):
        mean = jnp.mean(t, axis=(0, 2, 3), keepdims=True)
        var = jnp.mean((t - mean) ** 2, axis=(0, 2, 3), keepdims=True)
        return ((t - mean) * jax.lax.rsqrt(var + EPS)
                * gamma.reshape(1, -1, 1, 1) + beta.reshape(1, -1, 1, 1))

    r = jnp.maximum(bn(mm(params['w1'], x), params['g1'], params['b1']), 0.0)

    rp = jnp.pad(r, ((0, 0), (0, 0), (1, 1), (1, 1)))
    acc = jnp.zeros((N, params['w2'].shape[0], hs, ws), jnp.float32)
    for ky in range(3):
        for kx in range(3):
            acc = acc + mm(params['w2'][:, :, ky, kx],
                           rp[:, :, ky:ky + hs, kx:kx + ws])
    r = jnp.maximum(bn(acc, params['g2'], params['b2']), 0.0)

    y = bn(mm(params['w3'], r), params['g3'], params['b3'])
    sc = bn(mm(params['wsc'], x), params['gsc'], params['bsc'])
    return jnp.maximum(y + sc, 0.0)


if __name__ == "__main__":
    # Module config: in_channel=4, filters=4, stage=0, block=0 -> stride=1,
    # projection shortcut present.
    in_channel, filters = 4, 4
    key = jax.random.PRNGKey(0)
    k_x, k_p = jax.random.split(key)

    x = jax.random.normal(k_x, (2, in_channel, 16, 16), jnp.float32)   # NCHW
    params = init_params(k_p, in_channel, filters)

    y = bottleneck_2d_forward(x, params, stride=1)
    jax.block_until_ready(y)
    assert y.shape == (2, filters * 4, 16, 16), y.shape

    # Tight check against a reference that uses the same bf16 MXU-operand
    # precision as the kernel (validates layout / shifts / masks / BN plumbing).
    y_ref_matched = reference_forward(x, params, stride=1,
                                      matmul_dtype=jnp.bfloat16)
    err_matched = float(jnp.max(jnp.abs(y - y_ref_matched)))
    assert err_matched < 1e-2, f"max abs error vs bf16-matched ref: {err_matched}"

    # Loose check against the full-f32 reference (bf16 MXU operands trade a
    # little accuracy for 2-4x MXU throughput, as noted in the perf review).
    y_ref_f32 = reference_forward(x, params, stride=1, matmul_dtype=jnp.float32)
    err_f32 = float(jnp.max(jnp.abs(y - y_ref_f32)))
    assert err_f32 < 0.15, f"max abs error vs f32 ref: {err_f32}"

    print("KERNEL_OK")
</pallas_src>

<mosaic_0001>
module attributes {stable_mosaic.version = 11 : i64} {
  func.func @_stats_kernel(%arg0: i32, %arg1: i32, %arg2: memref<1x4x256xbf16, #tpu.memory_space<vmem>>, %arg3: memref<4x4xbf16, #tpu.memory_space<vmem>>, %arg4: memref<4x36xbf16, #tpu.memory_space<vmem>>, %arg5: memref<16x4xbf16, #tpu.memory_space<vmem>>, %arg6: memref<16x4xbf16, #tpu.memory_space<vmem>>, %arg7: memref<4x1xf32, #tpu.memory_space<vmem>>, %arg8: memref<4x1xf32, #tpu.memory_space<vmem>>, %arg9: memref<4x1xf32, #tpu.memory_space<vmem>>, %arg10: memref<4x1xf32, #tpu.memory_space<vmem>>, %arg11: memref<9x256xf32, #tpu.memory_space<vmem>>, %arg12: memref<2x4x1xf32, #tpu.memory_space<vmem>>, %arg13: memref<2x4x1xf32, #tpu.memory_space<vmem>>, %arg14: memref<2x16x1xf32, #tpu.memory_space<vmem>>, %arg15: memref<2x16x1xf32, #tpu.memory_space<vmem>>) attributes {dimension_semantics = [#tpu.dimension_semantics<arbitrary>, #tpu.dimension_semantics<arbitrary>], iteration_bounds = array<i64: 3, 2>, scalar_prefetch = 0 : i64, scratch_operands = 0 : i64, tpu.core_type = #tpu.core_type<tc>, window_params = [{transform_indices = @transform_0, window_bounds = array<i64: 1, 4, 256>}, {pipeline_mode = #tpu.pipeline_mode<synchronous>, transform_indices = @transform_1, window_bounds = array<i64: 4, 4>}, {pipeline_mode = #tpu.pipeline_mode<synchronous>, transform_indices = @transform_2, window_bounds = array<i64: 4, 36>}, {pipeline_mode = #tpu.pipeline_mode<synchronous>, transform_indices = @transform_3, window_bounds = array<i64: 16, 4>}, {pipeline_mode = #tpu.pipeline_mode<synchronous>, transform_indices = @transform_4, window_bounds = array<i64: 16, 4>}, {pipeline_mode = #tpu.pipeline_mode<synchronous>, transform_indices = @transform_5, window_bounds = array<i64: 4, 1>}, {pipeline_mode = #tpu.pipeline_mode<synchronous>, transform_indices = @transform_6, window_bounds = array<i64: 4, 1>}, {pipeline_mode = #tpu.pipeline_mode<synchronous>, transform_indices = @transform_7, window_bounds = array<i64: 4, 1>}, {pipeline_mode = #tpu.pipeline_mode<synchronous>, transform_indices = @transform_8, window_bounds = array<i64: 4, 1>}, {pipeline_mode = #tpu.pipeline_mode<synchronous>, transform_indices = @transform_9, window_bounds = array<i64: 9, 256>}, {pipeline_mode = #tpu.pipeline_mode<synchronous>, transform_indices = @transform_10, window_bounds = array<i64: 2, 4, 1>}, {pipeline_mode = #tpu.pipeline_mode<synchronous>, transform_indices = @transform_11, window_bounds = array<i64: 2, 4, 1>}, {pipeline_mode = #tpu.pipeline_mode<synchronous>, transform_indices = @transform_12, window_bounds = array<i64: 2, 16, 1>}, {pipeline_mode = #tpu.pipeline_mode<synchronous>, transform_indices = @transform_13, window_bounds = array<i64: 2, 16, 1>}]} {
    %c0_i32 = arith.constant 0 : i32
    %0 = arith.cmpi eq, %arg0, %c0_i32 : i32
    %c0_i32_0 = arith.constant 0 : i32
    %1 = arith.cmpi eq, %arg1, %c0_i32_0 : i32
    %2 = arith.andi %0, %1 : i1
    %3 = arith.extui %2 : i1 to i32
    %c0_i32_1 = arith.constant 0 : i32
    %4 = arith.cmpi ne, %3, %c0_i32_1 : i32
    scf.if %4 {
      %cst_9 = arith.constant 0.000000e+00 : f32
      %15 = vector.broadcast %cst_9 : f32 to vector<2x4x1xf32>
      %c0_10 = arith.constant 0 : index
      %c0_11 = arith.constant 0 : index
      %c0_12 = arith.constant 0 : index
      %16 = vector.load %arg12[%c0_10, %c0_11, %c0_12] : memref<2x4x1xf32, #tpu.memory_space<vmem>>, vector<2x4x1xf32>
      tpu.vector_store %arg12[%c0_10, %c0_11, %c0_12], %15 {strides = array<i32>} : memref<2x4x1xf32, #tpu.memory_space<vmem>>, vector<2x4x1xf32>,
      %cst_13 = arith.constant 0.000000e+00 : f32
      %17 = vector.broadcast %cst_13 : f32 to vector<2x4x1xf32>
      %c0_14 = arith.constant 0 : index
      %c0_15 = arith.constant 0 : index
      %c0_16 = arith.constant 0 : index
      %18 = vector.load %arg13[%c0_14, %c0_15, %c0_16] : memref<2x4x1xf32, #tpu.memory_space<vmem>>, vector<2x4x1xf32>
      tpu.vector_store %arg13[%c0_14, %c0_15, %c0_16], %17 {strides = array<i32>} : memref<2x4x1xf32, #tpu.memory_space<vmem>>, vector<2x4x1xf32>,
      %cst_17 = arith.constant 0.000000e+00 : f32
      %19 = vector.broadcast %cst_17 : f32 to vector<2x16x1xf32>
      %c0_18 = arith.constant 0 : index
      %c0_19 = arith.constant 0 : index
      %c0_20 = arith.constant 0 : index
      %20 = vector.load %arg14[%c0_18, %c0_19, %c0_20] : memref<2x16x1xf32, #tpu.memory_space<vmem>>, vector<2x16x1xf32>
      tpu.vector_store %arg14[%c0_18, %c0_19, %c0_20], %19 {strides = array<i32>} : memref<2x16x1xf32, #tpu.memory_space<vmem>>, vector<2x16x1xf32>,
      %cst_21 = arith.constant 0.000000e+00 : f32
      %21 = vector.broadcast %cst_21 : f32 to vector<2x16x1xf32>
      %c0_22 = arith.constant 0 : index
      %c0_23 = arith.constant 0 : index
      %c0_24 = arith.constant 0 : index
      %22 = vector.load %arg15[%c0_22, %c0_23, %c0_24] : memref<2x16x1xf32, #tpu.memory_space<vmem>>, vector<2x16x1xf32>
      tpu.vector_store %arg15[%c0_22, %c0_23, %c0_24], %21 {strides = array<i32>} : memref<2x16x1xf32, #tpu.memory_space<vmem>>, vector<2x16x1xf32>,
    } else {
    }
    %c0 = arith.constant 0 : index
    %c0_2 = arith.constant 0 : index
    %c0_3 = arith.constant 0 : index
    %5 = vector.load %arg2[%c0, %c0_2, %c0_3] : memref<1x4x256xbf16, #tpu.memory_space<vmem>>, vector<1x4x256xbf16>
    %6 = vector.shape_cast %5 : vector<1x4x256xbf16> to vector<4x256xbf16>
    %c0_4 = arith.constant 0 : index
    %c0_5 = arith.constant 0 : index
    %7 = vector.load %arg3[%c0_4, %c0_5] : memref<4x4xbf16, #tpu.memory_space<vmem>>, vector<4x4xbf16>
    %cst = arith.constant dense<0.000000e+00> : vector<4x256xf32>
    %8 = tpu.matmul %7, %6, %cst {dimension_numbers = #tpu.dot_dimension_numbers<[1], [0], [0], [1], [0, 0, 1, 1], [], []>} : vector<4x4xbf16>, vector<4x256xbf16>, vector<4x256xf32> -> vector<4x256xf32>
    %c0_i32_6 = arith.constant 0 : i32
    %9 = arith.cmpi eq, %arg0, %c0_i32_6 : i32
    %10 = arith.extui %9 : i1 to i32
    %c0_i32_7 = arith.constant 0 : i32
    %11 = arith.cmpi ne, %10, %c0_i32_7 : i32
    scf.if %11 {
      %c0_9 = arith.constant 0 : index
      %c0_10 = arith.constant 0 : index
      %c0_11 = arith.constant 0 : index
      %15 = vector.load %arg12[%c0_9, %c0_10, %c0_11] : memref<2x4x1xf32, #tpu.memory_space<vmem>>, vector<1x4x1xf32>
      %16 = vector.shape_cast %15 : vector<1x4x1xf32> to vector<4x1xf32>
      %cst_12 = arith.constant dense<0.000000e+00> : vector<4xf32>
      %17 = vector.multi_reduction <add>, %8, %cst_12 [1] : vector<4x256xf32> to vector<4xf32>
      %18 = vector.shape_cast %17 : vector<4xf32> to vector<4x1xf32>
      %19 = arith.addf %16, %18 : vector<4x1xf32>
      %c0_13 = arith.constant 0 : index
      %c0_14 = arith.constant 0 : index
      %c0_15 = arith.constant 0 : index
      %20 = vector.load %arg12[%c0_13, %c0_14, %c0_15] : memref<2x4x1xf32, #tpu.memory_space<vmem>>, vector<1x4x1xf32>
      %21 = vector.shape_cast %20 : vector<1x4x1xf32> to vector<4x1xf32>
      %22 = vector.shape_cast %19 : vector<4x1xf32> to vector<1x4x1xf32>
      tpu.vector_store %arg12[%c0_13, %c0_14, %c0_15], %22 {strides = array<i32>} : memref<2x4x1xf32, #tpu.memory_space<vmem>>, vector<1x4x1xf32>,
      %c1 = arith.constant 1 : index
      %c0_16 = arith.constant 0 : index
      %c0_17 = arith.constant 0 : index
      %23 = vector.load %arg12[%c1, %c0_16, %c0_17] : memref<2x4x1xf32, #tpu.memory_space<vmem>>, vector<1x4x1xf32>
      %24 = vector.shape_cast %23 : vector<1x4x1xf32> to vector<4x1xf32>
      %25 = arith.mulf %8, %8 : vector<4x256xf32>
      %cst_18 = arith.constant dense<0.000000e+00> : vector<4xf32>
      %26 = vector.multi_reduction <add>, %25, %cst_18 [1] : vector<4x256xf32> to vector<4xf32>
      %27 = vector.shape_cast %26 : vector<4xf32> to vector<4x1xf32>
      %28 = arith.addf %24, %27 : vector<4x1xf32>
      %c1_19 = arith.constant 1 : index
      %c0_20 = arith.constant 0 : index
      %c0_21 = arith.constant 0 : index
      %29 = vector.load %arg12[%c1_19, %c0_20, %c0_21] : memref<2x4x1xf32, #tpu.memory_space<vmem>>, vector<1x4x1xf32>
      %30 = vector.shape_cast %29 : vector<1x4x1xf32> to vector<4x1xf32>
      %31 = vector.shape_cast %28 : vector<4x1xf32> to vector<1x4x1xf32>
      tpu.vector_store %arg12[%c1_19, %c0_20, %c0_21], %31 {strides = array<i32>} : memref<2x4x1xf32, #tpu.memory_space<vmem>>, vector<1x4x1xf32>,
      %c0_22 = arith.constant 0 : index
      %c0_23 = arith.constant 0 : index
      %32 = vector.load %arg6[%c0_22, %c0_23] : memref<16x4xbf16, #tpu.memory_space<vmem>>, vector<16x4xbf16>
      %cst_24 = arith.constant dense<0.000000e+00> : vector<16x256xf32>
      %33 = tpu.matmul %32, %6, %cst_24 {dimension_numbers = #tpu.dot_dimension_numbers<[1], [0], [0], [1], [0, 0, 1, 1], [], []>} : vector<16x4xbf16>, vector<4x256xbf16>, vector<16x256xf32> -> vector<16x256xf32>
      %c0_25 = arith.constant 0 : index
      %c0_26 = arith.constant 0 : index
      %c0_27 = arith.constant 0 : index
      %34 = vector.load %arg15[%c0_25, %c0_26, %c0_27] : memref<2x16x1xf32, #tpu.memory_space<vmem>>, vector<1x16x1xf32>
      %35 = vector.shape_cast %34 : vector<1x16x1xf32> to vector<16x1xf32>
      %cst_28 = arith.constant dense<0.000000e+00> : vector<16xf32>
      %36 = vector.multi_reduction <add>, %33, %cst_28 [1] : vector<16x256xf32> to vector<16xf32>
      %37 = vector.shape_cast %36 : vector<16xf32> to vector<16x1xf32>
      %38 = arith.addf %35, %37 : vector<16x1xf32>
      %c0_29 = arith.constant 0 : index
      %c0_30 = arith.constant 0 : index
      %c0_31 = arith.constant 0 : index
      %39 = vector.load %arg15[%c0_29, %c0_30, %c0_31] : memref<2x16x1xf32, #tpu.memory_space<vmem>>, vector<1x16x1xf32>
      %40 = vector.shape_cast %39 : vector<1x16x1xf32> to vector<16x1xf32>
      %41 = vector.shape_cast %38 : vector<16x1xf32> to vector<1x16x1xf32>
      tpu.vector_store %arg15[%c0_29, %c0_30, %c0_31], %41 {strides = array<i32>} : memref<2x16x1xf32, #tpu.memory_space<vmem>>, vector<1x16x1xf32>,
      %c1_32 = arith.constant 1 : index
      %c0_33 = arith.constant 0 : index
      %c0_34 = arith.constant 0 : index
      %42 = vector.load %arg15[%c1_32, %c0_33, %c0_34] : memref<2x16x1xf32, #tpu.memory_space<vmem>>, vector<1x16x1xf32>
      %43 = vector.shape_cast %42 : vector<1x16x1xf32> to vector<16x1xf32>
      %44 = arith.mulf %33, %33 : vector<16x256xf32>
      %cst_35 = arith.constant dense<0.000000e+00> : vector<16xf32>
      %45 = vector.multi_reduction <add>, %44, %cst_35 [1] : vector<16x256xf32> to vector<16xf32>
      %46 = vector.shape_cast %45 : vector<16xf32> to vector<16x1xf32>
      %47 = arith.addf %43, %46 : vector<16x1xf32>
      %c1_36 = arith.constant 1 : index
      %c0_37 = arith.constant 0 : index
      %c0_38 = arith.constant 0 : index
      %48 = vector.load %arg15[%c1_36, %c0_37, %c0_38] : memref<2x16x1xf32, #tpu.memory_space<vmem>>, vector<1x16x1xf32>
      %49 = vector.shape_cast %48 : vector<1x16x1xf32> to vector<16x1xf32>
      %50 = vector.shape_cast %47 : vector<16x1xf32> to vector<1x16x1xf32>
      tpu.vector_store %arg15[%c1_36, %c0_37, %c0_38], %50 {strides = array<i32>} : memref<2x16x1xf32, #tpu.memory_space<vmem>>, vector<1x16x1xf32>,
    } else {
    }
    %c1_i32 = arith.constant 1 : i32
    %12 = arith.cmpi sge, %arg0, %c1_i32 : i32
    %13 = arith.extui %12 : i1 to i32
    %c0_i32_8 = arith.constant 0 : i32
    %14 = arith.cmpi ne, %13, %c0_i32_8 : i32
    scf.if %14 {
      %c0_9 = arith.constant 0 : index
      %c0_10 = arith.constant 0 : index
      %c0_11 = arith.constant 0 : index
      %15 = vector.load %arg12[%c0_9, %c0_10, %c0_11] : memref<2x4x1xf32, #tpu.memory_space<vmem>>, vector<1x4x1xf32>
      %16 = vector.shape_cast %15 : vector<1x4x1xf32> to vector<4x1xf32>
      %cst_12 = arith.constant 0.001953125 : f32
      %17 = vector.broadcast %cst_12 : f32 to vector<4x1xf32>
      %18 = arith.mulf %16, %17 : vector<4x1xf32>
      %c1 = arith.constant 1 : index
      %c0_13 = arith.constant 0 : index
      %c0_14 = arith.constant 0 : index
      %19 = vector.load %arg12[%c1, %c0_13, %c0_14] : memref<2x4x1xf32, #tpu.memory_space<vmem>>, vector<1x4x1xf32>
      %20 = vector.shape_cast %19 : vector<1x4x1xf32> to vector<4x1xf32>
      %cst_15 = arith.constant 0.001953125 : f32
      %21 = vector.broadcast %cst_15 : f32 to vector<4x1xf32>
      %22 = arith.mulf %20, %21 : vector<4x1xf32>
      %23 = arith.mulf %18, %18 : vector<4x1xf32>
      %24 = arith.subf %22, %23 : vector<4x1xf32>
      %cst_16 = arith.constant 9.99999974E-6 : f32
      %25 = vector.broadcast %cst_16 : f32 to vector<4x1xf32>
      %26 = arith.addf %24, %25 : vector<4x1xf32>
      %27 = math.rsqrt %26 : vector<4x1xf32>
      %c0_17 = arith.constant 0 : index
      %c0_18 = arith.constant 0 : index
      %28 = vector.load %arg7[%c0_17, %c0_18] : memref<4x1xf32, #tpu.memory_space<vmem>>, vector<4x1xf32>
      %29 = arith.mulf %27, %28 : vector<4x1xf32>
      %30 = vector.broadcast %18 : vector<4x1xf32> to vector<4x256xf32>
      %31 = arith.subf %8, %30 : vector<4x256xf32>
      %32 = vector.broadcast %29 : vector<4x1xf32> to vector<4x256xf32>
      %33 = arith.mulf %31, %32 : vector<4x256xf32>
      %c0_19 = arith.constant 0 : index
      %c0_20 = arith.constant 0 : index
      %34 = vector.load %arg8[%c0_19, %c0_20] : memref<4x1xf32, #tpu.memory_space<vmem>>, vector<4x1xf32>
      %35 = vector.broadcast %34 : vector<4x1xf32> to vector<4x256xf32>
      %36 = arith.addf %33, %35 : vector<4x256xf32>
      %cst_21 = arith.constant 0.000000e+00 : f32
      %37 = vector.broadcast %cst_21 : f32 to vector<4x256xf32>
      %38 = arith.maximumf %36, %37 : vector<4x256xf32>
      %c17_i32 = arith.constant 17 : i32
      %39 = tpu.dynamic_rotate %38 by %c17_i32 dim 1 : vector<4x256xf32>, i32 -> vector<4x256xf32>
      %c0_22 = arith.constant 0 : index
      %c0_23 = arith.constant 0 : index
      %40 = vector.load %arg11[%c0_22, %c0_23] : memref<9x256xf32, #tpu.memory_space<vmem>>, vector<1x256xf32>
      %41 = vector.broadcast %40 : vector<1x256xf32> to vector<4x256xf32>
      %42 = arith.mulf %39, %41 : vector<4x256xf32>
      %c16_i32 = arith.constant 16 : i32
      %43 = tpu.dynamic_rotate %38 by %c16_i32 dim 1 : vector<4x256xf32>, i32 -> vector<4x256xf32>
      %c1_24 = arith.constant 1 : index
      %c0_25 = arith.constant 0 : index
      %44 = vector.load %arg11[%c1_24, %c0_25] : memref<9x256xf32, #tpu.memory_space<vmem>>, vector<1x256xf32>
      %45 = vector.broadcast %44 : vector<1x256xf32> to vector<4x256xf32>
      %46 = arith.mulf %43, %45 : vector<4x256xf32>
      %c15_i32 = arith.constant 15 : i32
      %47 = tpu.dynamic_rotate %38 by %c15_i32 dim 1 : vector<4x256xf32>, i32 -> vector<4x256xf32>
      %c2 = arith.constant 2 : index
      %c0_26 = arith.constant 0 : index
      %48 = vector.load %arg11[%c2, %c0_26] : memref<9x256xf32, #tpu.memory_space<vmem>>, vector<1x256xf32>
      %49 = vector.broadcast %48 : vector<1x256xf32> to vector<4x256xf32>
      %50 = arith.mulf %47, %49 : vector<4x256xf32>
      %c1_i32_27 = arith.constant 1 : i32
      %51 = tpu.dynamic_rotate %38 by %c1_i32_27 dim 1 : vector<4x256xf32>, i32 -> vector<4x256xf32>
      %c3 = arith.constant 3 : index
      %c0_28 = arith.constant 0 : index
      %52 = vector.load %arg11[%c3, %c0_28] : memref<9x256xf32, #tpu.memory_space<vmem>>, vector<1x256xf32>
      %53 = vector.broadcast %52 : vector<1x256xf32> to vector<4x256xf32>
      %54 = arith.mulf %51, %53 : vector<4x256xf32>
      %c255_i32 = arith.constant 255 : i32
      %55 = tpu.dynamic_rotate %38 by %c255_i32 dim 1 : vector<4x256xf32>, i32 -> vector<4x256xf32>
      %c5 = arith.constant 5 : index
      %c0_29 = arith.constant 0 : index
      %56 = vector.load %arg11[%c5, %c0_29] : memref<9x256xf32, #tpu.memory_space<vmem>>, vector<1x256xf32>
      %57 = vector.broadcast %56 : vector<1x256xf32> to vector<4x256xf32>
      %58 = arith.mulf %55, %57 : vector<4x256xf32>
      %c241_i32 = arith.constant 241 : i32
      %59 = tpu.dynamic_rotate %38 by %c241_i32 dim 1 : vector<4x256xf32>, i32 -> vector<4x256xf32>
      %c6 = arith.constant 6 : index
      %c0_30 = arith.constant 0 : index
      %60 = vector.load %arg11[%c6, %c0_30] : memref<9x256xf32, #tpu.memory_space<vmem>>, vector<1x256xf32>
      %61 = vector.broadcast %60 : vector<1x256xf32> to vector<4x256xf32>
      %62 = arith.mulf %59, %61 : vector<4x256xf32>
      %c240_i32 = arith.constant 240 : i32
      %63 = tpu.dynamic_rotate %38 by %c240_i32 dim 1 : vector<4x256xf32>, i32 -> vector<4x256xf32>
      %c7 = arith.constant 7 : index
      %c0_31 = arith.constant 0 : index
      %64 = vector.load %arg11[%c7, %c0_31] : memref<9x256xf32, #tpu.memory_space<vmem>>, vector<1x256xf32>
      %65 = vector.broadcast %64 : vector<1x256xf32> to vector<4x256xf32>
      %66 = arith.mulf %63, %65 : vector<4x256xf32>
      %c239_i32 = arith.constant 239 : i32
      %67 = tpu.dynamic_rotate %38 by %c239_i32 dim 1 : vector<4x256xf32>, i32 -> vector<4x256xf32>
      %c8 = arith.constant 8 : index
      %c0_32 = arith.constant 0 : index
      %68 = vector.load %arg11[%c8, %c0_32] : memref<9x256xf32, #tpu.memory_space<vmem>>, vector<1x256xf32>
      %69 = vector.broadcast %68 : vector<1x256xf32> to vector<4x256xf32>
      %70 = arith.mulf %67, %69 : vector<4x256xf32>
      %71 = tpu.concatenate %42, %46, %50, %54, %38, %58, %62, %66, %70 in 0 : vector<4x256xf32>, vector<4x256xf32>, vector<4x256xf32>, vector<4x256xf32>, vector<4x256xf32>, vector<4x256xf32>, vector<4x256xf32>, vector<4x256xf32>, vector<4x256xf32> -> vector<36x256xf32>
      %72 = arith.truncf %71 : vector<36x256xf32> to vector<36x256xbf16>
      %c0_33 = arith.constant 0 : index
      %c0_34 = arith.constant 0 : index
      %73 = vector.load %arg4[%c0_33, %c0_34] : memref<4x36xbf16, #tpu.memory_space<vmem>>, vector<4x36xbf16>
      %cst_35 = arith.constant dense<0.000000e+00> : vector<4x256xf32>
      %74 = tpu.matmul %73, %72, %cst_35 {dimension_numbers = #tpu.dot_dimension_numbers<[1], [0], [0], [1], [0, 0, 1, 1], [], []>} : vector<4x36xbf16>, vector<36x256xbf16>, vector<4x256xf32> -> vector<4x256xf32>
      %c1_i32_36 = arith.constant 1 : i32
      %75 = arith.cmpi eq, %arg0, %c1_i32_36 : i32
      %76 = arith.extui %75 : i1 to i32
      %c0_i32_37 = arith.constant 0 : i32
      %77 = arith.cmpi ne, %76, %c0_i32_37 : i32
      scf.if %77 {
        %c0_39 = arith.constant 0 : index
        %c0_40 = arith.constant 0 : index
        %c0_41 = arith.constant 0 : index
        %81 = vector.load %arg13[%c0_39, %c0_40, %c0_41] : memref<2x4x1xf32, #tpu.memory_space<vmem>>, vector<1x4x1xf32>
        %82 = vector.shape_cast %81 : vector<1x4x1xf32> to vector<4x1xf32>
        %cst_42 = arith.constant dense<0.000000e+00> : vector<4xf32>
        %83 = vector.multi_reduction <add>, %74, %cst_42 [1] : vector<4x256xf32> to vector<4xf32>
        %84 = vector.shape_cast %83 : vector<4xf32> to vector<4x1xf32>
        %85 = arith.addf %82, %84 : vector<4x1xf32>
        %c0_43 = arith.constant 0 : index
        %c0_44 = arith.constant 0 : index
        %c0_45 = arith.constant 0 : index
        %86 = vector.load %arg13[%c0_43, %c0_44, %c0_45] : memref<2x4x1xf32, #tpu.memory_space<vmem>>, vector<1x4x1xf32>
        %87 = vector.shape_cast %86 : vector<1x4x1xf32> to vector<4x1xf32>
        %88 = vector.shape_cast %85 : vector<4x1xf32> to vector<1x4x1xf32>
        tpu.vector_store %arg13[%c0_43, %c0_44, %c0_45], %88 {strides = array<i32>} : memref<2x4x1xf32, #tpu.memory_space<vmem>>, vector<1x4x1xf32>,
        %c1_46 = arith.constant 1 : index
        %c0_47 = arith.constant 0 : index
        %c0_48 = arith.constant 0 : index
        %89 = vector.load %arg13[%c1_46, %c0_47, %c0_48] : memref<2x4x1xf32, #tpu.memory_space<vmem>>, vector<1x4x1xf32>
        %90 = vector.shape_cast %89 : vector<1x4x1xf32> to vector<4x1xf32>
        %91 = arith.mulf %74, %74 : vector<4x256xf32>
        %cst_49 = arith.constant dense<0.000000e+00> : vector<4xf32>
        %92 = vector.multi_reduction <add>, %91, %cst_49 [1] : vector<4x256xf32> to vector<4xf32>
        %93 = vector.shape_cast %92 : vector<4xf32> to vector<4x1xf32>
        %94 = arith.addf %90, %93 : vector<4x1xf32>
        %c1_50 = arith.constant 1 : index
        %c0_51 = arith.constant 0 : index
        %c0_52 = arith.constant 0 : index
        %95 = vector.load %arg13[%c1_50, %c0_51, %c0_52] : memref<2x4x1xf32, #tpu.memory_space<vmem>>, vector<1x4x1xf32>
        %96 = vector.shape_cast %95 : vector<1x4x1xf32> to vector<4x1xf32>
        %97 = vector.shape_cast %94 : vector<4x1xf32> to vector<1x4x1xf32>
        tpu.vector_store %arg13[%c1_50, %c0_51, %c0_52], %97 {strides = array<i32>} : memref<2x4x1xf32, #tpu.memory_space<vmem>>, vector<1x4x1xf32>,
      } else {
      }
      %c2_i32 = arith.constant 2 : i32
      %78 = arith.cmpi eq, %arg0, %c2_i32 : i32
      %79 = arith.extui %78 : i1 to i32
      %c0_i32_38 = arith.constant 0 : i32
      %80 = arith.cmpi ne, %79, %c0_i32_38 : i32
      scf.if %80 {
        %c0_39 = arith.constant 0 : index
        %c0_40 = arith.constant 0 : index
        %c0_41 = arith.constant 0 : index
        %81 = vector.load %arg13[%c0_39, %c0_40, %c0_41] : memref<2x4x1xf32, #tpu.memory_space<vmem>>, vector<1x4x1xf32>
        %82 = vector.shape_cast %81 : vector<1x4x1xf32> to vector<4x1xf32>
        %cst_42 = arith.constant 0.001953125 : f32
        %83 = vector.broadcast %cst_42 : f32 to vector<4x1xf32>
        %84 = arith.mulf %82, %83 : vector<4x1xf32>
        %c1_43 = arith.constant 1 : index
        %c0_44 = arith.constant 0 : index
        %c0_45 = arith.constant 0 : index
        %85 = vector.load %arg13[%c1_43, %c0_44, %c0_45] : memref<2x4x1xf32, #tpu.memory_space<vmem>>, vector<1x4x1xf32>
        %86 = vector.shape_cast %85 : vector<1x4x1xf32> to vector<4x1xf32>
        %cst_46 = arith.constant 0.001953125 : f32
        %87 = vector.broadcast %cst_46 : f32 to vector<4x1xf32>
        %88 = arith.mulf %86, %87 : vector<4x1xf32>
        %89 = arith.mulf %84, %84 : vector<4x1xf32>
        %90 = arith.subf %88, %89 : vector<4x1xf32>
        %cst_47 = arith.constant 9.99999974E-6 : f32
        %91 = vector.broadcast %cst_47 : f32 to vector<4x1xf32>
        %92 = arith.addf %90, %91 : vector<4x1xf32>
        %93 = math.rsqrt %92 : vector<4x1xf32>
        %c0_48 = arith.constant 0 : index
        %c0_49 = arith.constant 0 : index
        %94 = vector.load %arg9[%c0_48, %c0_49] : memref<4x1xf32, #tpu.memory_space<vmem>>, vector<4x1xf32>
        %95 = arith.mulf %93, %94 : vector<4x1xf32>
        %96 = vector.broadcast %84 : vector<4x1xf32> to vector<4x256xf32>
        %97 = arith.subf %74, %96 : vector<4x256xf32>
        %98 = vector.broadcast %95 : vector<4x1xf32> to vector<4x256xf32>
        %99 = arith.mulf %97, %98 : vector<4x256xf32>
        %c0_50 = arith.constant 0 : index
        %c0_51 = arith.constant 0 : index
        %100 = vector.load %arg10[%c0_50, %c0_51] : memref<4x1xf32, #tpu.memory_space<vmem>>, vector<4x1xf32>
        %101 = vector.broadcast %100 : vector<4x1xf32> to vector<4x256xf32>
        %102 = arith.addf %99, %101 : vector<4x256xf32>
        %cst_52 = arith.constant 0.000000e+00 : f32
        %103 = vector.broadcast %cst_52 : f32 to vector<4x256xf32>
        %104 = arith.maximumf %102, %103 : vector<4x256xf32>
        %c0_53 = arith.constant 0 : index
        %c0_54 = arith.constant 0 : index
        %105 = vector.load %arg5[%c0_53, %c0_54] : memref<16x4xbf16, #tpu.memory_space<vmem>>, vector<16x4xbf16>
        %106 = arith.truncf %104 : vector<4x256xf32> to vector<4x256xbf16>
        %cst_55 = arith.constant dense<0.000000e+00> : vector<16x256xf32>
        %107 = tpu.matmul %105, %106, %cst_55 {dimension_numbers = #tpu.dot_dimension_numbers<[1], [0], [0], [1], [0, 0, 1, 1], [], []>} : vector<16x4xbf16>, vector<4x256xbf16>, vector<16x256xf32> -> vector<16x256xf32>
        %c0_56 = arith.constant 0 : index
        %c0_57 = arith.constant 0 : index
        %c0_58 = arith.constant 0 : index
        %108 = vector.load %arg14[%c0_56, %c0_57, %c0_58] : memref<2x16x1xf32, #tpu.memory_space<vmem>>, vector<1x16x1xf32>
        %109 = vector.shape_cast %108 : vector<1x16x1xf32> to vector<16x1xf32>
        %cst_59 = arith.constant dense<0.000000e+00> : vector<16xf32>
        %110 = vector.multi_reduction <add>, %107, %cst_59 [1] : vector<16x256xf32> to vector<16xf32>
        %111 = vector.shape_cast %110 : vector<16xf32> to vector<16x1xf32>
        %112 = arith.addf %109, %111 : vector<16x1xf32>
        %c0_60 = arith.constant 0 : index
        %c0_61 = arith.constant 0 : index
        %c0_62 = arith.constant 0 : index
        %113 = vector.load %arg14[%c0_60, %c0_61, %c0_62] : memref<2x16x1xf32, #tpu.memory_space<vmem>>, vector<1x16x1xf32>
        %114 = vector.shape_cast %113 : vector<1x16x1xf32> to vector<16x1xf32>
        %115 = vector.shape_cast %112 : vector<16x1xf32> to vector<1x16x1xf32>
        tpu.vector_store %arg14[%c0_60, %c0_61, %c0_62], %115 {strides = array<i32>} : memref<2x16x1xf32, #tpu.memory_space<vmem>>, vector<1x16x1xf32>,
        %c1_63 = arith.constant 1 : index
        %c0_64 = arith.constant 0 : index
        %c0_65 = arith.constant 0 : index
        %116 = vector.load %arg14[%c1_63, %c0_64, %c0_65] : memref<2x16x1xf32, #tpu.memory_space<vmem>>, vector<1x16x1xf32>
        %117 = vector.shape_cast %116 : vector<1x16x1xf32> to vector<16x1xf32>
        %118 = arith.mulf %107, %107 : vector<16x256xf32>
        %cst_66 = arith.constant dense<0.000000e+00> : vector<16xf32>
        %119 = vector.multi_reduction <add>, %118, %cst_66 [1] : vector<16x256xf32> to vector<16xf32>
        %120 = vector.shape_cast %119 : vector<16xf32> to vector<16x1xf32>
        %121 = arith.addf %117, %120 : vector<16x1xf32>
        %c1_67 = arith.constant 1 : index
        %c0_68 = arith.constant 0 : index
        %c0_69 = arith.constant 0 : index
        %122 = vector.load %arg14[%c1_67, %c0_68, %c0_69] : memref<2x16x1xf32, #tpu.memory_space<vmem>>, vector<1x16x1xf32>
        %123 = vector.shape_cast %122 : vector<1x16x1xf32> to vector<16x1xf32>
        %124 = vector.shape_cast %121 : vector<16x1xf32> to vector<1x16x1xf32>
        tpu.vector_store %arg14[%c1_67, %c0_68, %c0_69], %124 {strides = array<i32>} : memref<2x16x1xf32, #tpu.memory_space<vmem>>, vector<1x16x1xf32>,
      } else {
      }
    } else {
    }
    return
  }
  func.func @transform_0(%arg0: i32, %arg1: i32) -> (i32, i32, i32) {
    %c0_i32 = arith.constant 0 : i32
    %c0_i32_0 = arith.constant 0 : i32
    %c0_i32_1 = arith.constant 0 : i32
    return %arg1, %c0_i32, %c0_i32_0 : i32, i32, i32
  }
  func.func @transform_1(%arg0: i32, %arg1: i32) -> (i32, i32) {
    %c0_i32 = arith.constant 0 : i32
    %c0_i32_0 = arith.constant 0 : i32
    %c0_i32_1 = arith.constant 0 : i32
    return %c0_i32, %c0_i32_0 : i32, i32
  }
  func.func @transform_2(%arg0: i32, %arg1: i32) -> (i32, i32) {
    %c0_i32 = arith.constant 0 : i32
    %c0_i32_0 = arith.constant 0 : i32
    %c0_i32_1 = arith.constant 0 : i32
    return %c0_i32, %c0_i32_0 : i32, i32
  }
  func.func @transform_3(%arg0: i32, %arg1: i32) -> (i32, i32) {
    %c0_i32 = arith.constant 0 : i32
    %c0_i32_0 = arith.constant 0 : i32
    %c0_i32_1 = arith.constant 0 : i32
    return %c0_i32, %c0_i32_0 : i32, i32
  }
  func.func @transform_4(%arg0: i32, %arg1: i32) -> (i32, i32) {
    %c0_i32 = arith.constant 0 : i32
    %c0_i32_0 = arith.constant 0 : i32
    %c0_i32_1 = arith.constant 0 : i32
    return %c0_i32, %c0_i32_0 : i32, i32
  }
  func.func @transform_5(%arg0: i32, %arg1: i32) -> (i32, i32) {
    %c0_i32 = arith.constant 0 : i32
    %c0_i32_0 = arith.constant 0 : i32
    %c0_i32_1 = arith.constant 0 : i32
    return %c0_i32, %c0_i32_0 : i32, i32
  }
  func.func @transform_6(%arg0: i32, %arg1: i32) -> (i32, i32) {
    %c0_i32 = arith.constant 0 : i32
    %c0_i32_0 = arith.constant 0 : i32
    %c0_i32_1 = arith.constant 0 : i32
    return %c0_i32, %c0_i32_0 : i32, i32
  }
  func.func @transform_7(%arg0: i32, %arg1: i32) -> (i32, i32) {
    %c0_i32 = arith.constant 0 : i32
    %c0_i32_0 = arith.constant 0 : i32
    %c0_i32_1 = arith.constant 0 : i32
    return %c0_i32, %c0_i32_0 : i32, i32
  }
  func.func @transform_8(%arg0: i32, %arg1: i32) -> (i32, i32) {
    %c0_i32 = arith.constant 0 : i32
    %c0_i32_0 = arith.constant 0 : i32
    %c0_i32_1 = arith.constant 0 : i32
    return %c0_i32, %c0_i32_0 : i32, i32
  }
  func.func @transform_9(%arg0: i32, %arg1: i32) -> (i32, i32) {
    %c0_i32 = arith.constant 0 : i32
    %c0_i32_0 = arith.constant 0 : i32
    %c0_i32_1 = arith.constant 0 : i32
    return %c0_i32, %c0_i32_0 : i32, i32
  }
  func.func @transform_10(%arg0: i32, %arg1: i32) -> (i32, i32, i32) {
    %c0_i32 = arith.constant 0 : i32
    %c0_i32_0 = arith.constant 0 : i32
    %c0_i32_1 = arith.constant 0 : i32
    %c0_i32_2 = arith.constant 0 : i32
    return %c0_i32, %c0_i32_0, %c0_i32_1 : i32, i32, i32
  }
  func.func @transform_11(%arg0: i32, %arg1: i32) -> (i32, i32, i32) {
    %c0_i32 = arith.constant 0 : i32
    %c0_i32_0 = arith.constant 0 : i32
    %c0_i32_1 = arith.constant 0 : i32
    %c0_i32_2 = arith.constant 0 : i32
    return %c0_i32, %c0_i32_0, %c0_i32_1 : i32, i32, i32
  }
  func.func @transform_12(%arg0: i32, %arg1: i32) -> (i32, i32, i32) {
    %c0_i32 = arith.constant 0 : i32
    %c0_i32_0 = arith.constant 0 : i32
    %c0_i32_1 = arith.constant 0 : i32
    %c0_i32_2 = arith.constant 0 : i32
    return %c0_i32, %c0_i32_0, %c0_i32_1 : i32, i32, i32
  }
  func.func @transform_13(%arg0: i32, %arg1: i32) -> (i32, i32, i32) {
    %c0_i32 = arith.constant 0 : i32
    %c0_i32_0 = arith.constant 0 : i32
    %c0_i32_1 = arith.constant 0 : i32
    %c0_i32_2 = arith.constant 0 : i32
    return %c0_i32, %c0_i32_0, %c0_i32_1 : i32, i32, i32
  }
}

</mosaic_0001>

<bundles_post_ra>
// kernel: tpu_custom_call.1
= control target key start
LH: loop header
LB: loop body
LE: loop exit
PB: predicated region body
PF: predicated region fallthrough
CT: control target
= control target key end

     0   :  { %s1370_s25 = smov 0   ;;  %s1372_s26 = smov 0   ;;  %s1693_s0 = inlined_call_operand.vmem [shape: bf16[2,4,256], index: 0, kind: input, shape index: {}]   ;;  %s1694_s1 = inlined_call_operand.vmem [shape: bf16[4,4], index: 1, kind: input, shape index: {}]   ;;  %s1695_s2 = inlined_call_operand.vmem [shape: bf16[4,36], index: 2, kind: input, shape index: {}]   ;;  %s1696_s3 = inlined_call_operand.vmem [shape: bf16[16,4], index: 3, kind: input, shape index: {}]   ;;  %s1697_s4 = inlined_call_operand.vmem [shape: bf16[16,4], index: 4, kind: input, shape index: {}]   ;;  %s1698_s5 = inlined_call_operand.vmem [shape: f32[4,1], index: 5, kind: input, shape index: {}]   ;;  %s1699_s6 = inlined_call_operand.vmem [shape: f32[4,1], index: 6, kind: input, shape index: {}]   ;;  %s1700_s7 = inlined_call_operand.vmem [shape: f32[4,1], index: 7, kind: input, shape index: {}]   ;;  %s1701_s8 = inlined_call_operand.vmem [shape: f32[4,1], index: 8, kind: input, shape index: {}]   ;;  %s1702_s9 = inlined_call_operand.vmem [shape: f32[9,256], index: 9, kind: input, shape index: {}]   ;;  %s1703_s10 = inlined_call_operand.vmem [shape: f32[2,4,1], index: 10, kind: output, shape index: {0}]   ;;  %s1704_s11 = inlined_call_operand.vmem [shape: f32[2,4,1], index: 11, kind: output, shape index: {1}]   ;;  %s1705_s12 = inlined_call_operand.vmem [shape: f32[2,16,1], index: 12, kind: output, shape index: {2}]   ;;  %s1706_s13 = inlined_call_operand.vmem [shape: f32[2,16,1], index: 13, kind: output, shape index: {3}]  }
   0x1   :  { %1707 = sst [smem:[#allocation3_spill]] %s1693_s0  ;;  %s1374_s27 = smov 0  }
   0x2   :  { %s1376_s28 = smov 0   ;;  %s1378_s29 = smov 0  }
   0x3 LB: > { %s33_s30 = sadd.s32 1, %s1277_s27  ;;  %s36_s14 = sadd.s32 1, %s1281_s28  ;;  %s1285_s29 = sphi %s1378_s29, %s24_s29   ;;  %s1281_s28 = sphi %s1376_s28, %s1714_s28   ;;  %s1277_s27 = sphi %s1374_s27, %s1713_s27   ;;  %s1273_s26 = sphi %s1372_s26, %s1712_s26   ;;  %s1269_s25 = sphi %s1370_s25, %s1711_s25  }
   0x4   : > { %p34_p0 = scmp.ge.s32.totalorder %s33_s30, 2  ;;  %p1142_p1 = scmp.ge.s32.totalorder %s1285_s29, 1 }
   0x5   : > { %p386_p2 = scmp.lt.s32.totalorder %s1285_s29, 7 }
   0x6   : > { %s1716_s30 = smov (%p34_p0, %s33_s30), 0  ;;  %s1718_s14 = smov (!%p34_p0, %s36_s14), %s1281_s28 }
   0x7   : > { %p387_p3 = pnand %p1142_p1, %p386_p2  ;;  %p38_p4 = scmp.ge.s32.totalorder %s1718_s14, 3 }
   0x8   : > { %p425_p5 = scmp.lt.s32.totalorder (!%p387_p3), %s1269_s25, 1  ;;  %p431_p6 = scmp.eq.s32.totalorder (!%p387_p3), %s1273_s26, 0 }
   0x9   : > { %s1720_s14 = smov (%p38_p4, %s1718_s14), 0  ;;  %390 = sbr.rel (%p387_p3) target bundleno = 1820 (0x71c), region = 60 }
   0xa   : > { %1708 = sst [smem:[#allocation2_spill]] %s1720_s14  ;;  %p432_p7 = scmp.eq.s32.totalorder (!%p387_p3), %s1269_s25, 0 }
   0xb   : > { %s1709_s0 = sld [smem:[#allocation3_spill]] (!%p387_p3) }
   0xc   : > { %p433_p8 = pnand (!%p387_p3), %p432_p7, %p431_p6 }
  0x10   : > { %s1722_s25 = smov (!%p425_p5, %s1269_s25), 1  ;;  %436 = sbr.rel (%p433_p8) target bundleno = 24 (0x18), region = 64 }
  0x11   : > { %s1183_s15 = sshll.u32 %s1722_s25, 2  ;;  %vm437_vm0 = vcmask (!%p433_p8), 3072   ;;  %vm442_vm1 = vcmask (!%p433_p8), 7168   ;;  %v1287_v0 = vmov (!%p433_p8), 0.0  }
  0x12   : > { %s429_s18 = scalar_lea.vmem %s1709_s0, %s1183_s15  ;;  %438 = vst.msk [vmem:[%s1703_s10] sm:$0xf] (!%p433_p8), %vm437_vm0, %v1287_v0  ;;  %439 = vst.msk [vmem:[%s1703_s10 + $0x4] sm:$0xf] (!%p433_p8), %vm437_vm0, %v1287_v0 }
  0x13   : > { %440 = vst.msk [vmem:[%s1704_s11] sm:$0xf] (!%p433_p8), %vm437_vm0, %v1287_v0  ;;  %441 = vst.msk [vmem:[%s1704_s11 + $0x4] sm:$0xf] (!%p433_p8), %vm437_vm0, %v1287_v0 }
  0x14   : > { %443 = vst.msk [vmem:[%s1705_s12] sm:$0xff] (!%p433_p8), %vm442_vm1, %v1287_v0  ;;  %444 = vst.msk [vmem:[%s1705_s12 + $0x8] sm:$0xff] (!%p433_p8), %vm442_vm1, %v1287_v0 }
  0x15   : > { %445 = vst.msk [vmem:[%s1705_s12 + $0x10] sm:$0xff] (!%p433_p8), %vm442_vm1, %v1287_v0  ;;  %446 = vst.msk [vmem:[%s1705_s12 + $0x18] sm:$0xff] (!%p433_p8), %vm442_vm1, %v1287_v0 }
  0x16   : > { %447 = vst.msk [vmem:[%s1706_s13] sm:$0xff] (!%p433_p8), %vm442_vm1, %v1287_v0  ;;  %448 = vst.msk [vmem:[%s1706_s13 + $0x8] sm:$0xff] (!%p433_p8), %vm442_vm1, %v1287_v0 }
  0x17   : > { %449 = vst.msk [vmem:[%s1706_s13 + $0x10] sm:$0xff] %vm442_vm1, %v1287_v0  ;;  %450 = vst.msk [vmem:[%s1706_s13 + $0x18] sm:$0xff] %vm442_vm1, %v1287_v0 }
  0x18 PF: > { %v1145_v1 = vld.sshfl [vmem:[%s429_s18] sm:$0x33 pattern:$0x76325410]  ;;  %vm466_vm2 = vcmask 1041408   ;;  %v1288_v4 = vmov 0  }
  0x19   : > { %v461_v2 = vcombine.high %v1145_v1, %v1145_v1  ;;  %v468_v3 = vsel %vm466_vm2, %v1145_v1, 0  ;;  %505 = vmatprep.mubr.bf16.mxu0 %v1288_v4  ;;  %v452_v5 = vld [vmem:[%s1694_s1] sm:$0x3]  ;;  %vm462_vm3 = vcmask 31744   ;;  %p1148_p9 = scmp.ne.s32.totalorder %s1273_s26, 0 }
  0x1a   : > { %v1237_v10 = vld [vmem:[%s1697_s4] sm:$0xff] (!%p1148_p9)   ;;  %v1289_v11 = vmov (!%p1148_p9), 0   ;;  %vm518_vm4 = vcmask (!%p1148_p9), 1043456   ;;  %vm525_vm5 = vcmask (!%p1148_p9), 3072   ;;  %vm601_vm6 = vcmask (!%p1148_p9), 7168  }
  0x1b   : > { %1146 = vmatprep.subr.msk.bf16.mxu0 %vm466_vm2, %v461_v2  ;;  %v517_v20 = vld [vmem:[%s1703_s10] sm:$0xf] (!%p1148_p9)  ;;  %v1149_v35 = vld [vmem:[%s1703_s10 + $0x4] sm:$0xf] (!%p1148_p9) }
  0x1c   : > { %474 = vmatpush1.bf16.msra.mxu0 %v468_v3 }
  0x1d   : > { %1152 = vmatprep.subr.msk.bf16.mxu0 (!%p1148_p9), %vm466_vm2, %v461_v2 }
  0x1e   : > { %v591_v38 = vld [vmem:[%s1706_s13] sm:$0xff] (!%p1148_p9)  ;;  %v1154_v40 = vld [vmem:[%s1706_s13 + $0x10] sm:$0xff] (!%p1148_p9)  ;;  %v592_v43 = vld [vmem:[%s1706_s13 + $0x8] sm:$0xff] (!%p1148_p9) }
  0x1f   : > { %1147 = vmatmul.mubr.msk.bf16.vlgmr.msra.gmra.mrb[0].mxu0 %vm462_vm3, %v452_v5  ;;  %v1155_v47 = vld [vmem:[%s1706_s13 + $0x18] sm:$0xff] (!%p1148_p9) }
  0x20   : > { %549 = vmatpush1.bf16.msra.mxu0 (!%p1148_p9), %v468_v3  ;;  %580 = vmatprep.mubr.bf16.mxu0 (!%p1148_p9), %v1289_v11 }
  0xef   : > { %516 = sbr.rel (%p1148_p9) target bundleno = 613 (0x265), region = 68 }
  0xf2   : > { %v1448_v6 = vpop.f32.mrb[0].mxu0 }
  0xf3   : > { %v1450_v7 = vpop.f32.mrb[1].mxu0  ;;  %v519_v12 = vsel (!%p1148_p9), %vm518_vm4, %v1448_v6, 0.0  ;;  %v529_v15 = vmul.f32 (!%p1148_p9), %v1448_v6, %v1448_v6 }
  0xf4   : > { %v511_v8 = vpop.f32.mrb[2].mxu0  ;;  %v520_v13 = vsel (!%p1148_p9), %vm518_vm4, %v1450_v7, 0.0  ;;  %v530_v16 = vmul.f32 (!%p1148_p9), %v1450_v7, %v1450_v7 }
  0xf5   : > { %v512_v9 = vpop.f32.mrb[3].mxu0  ;;  %v521_v14 = vadd.f32 (!%p1148_p9), %v520_v13, %v519_v12  ;;  %1153 = vmatmul.mubr.msk.bf16.vlgmr.msra.gmra.mrb[0].mxu0 (!%p1148_p9), %vm462_vm3, %v1237_v10  ;;  %v531_v17 = vsel (!%p1148_p9), %vm518_vm4, %v529_v15, 0.0 }
  0xf6   : > { %v532_v18 = vsel %vm518_vm4, %v530_v16, 0.0 }
  0xf7   : > { %522 = vadd.xlane.f32.xlu0 %v521_v14  ;;  %v533_v19 = vadd.f32 %v532_v18, %v531_v17 }
  0xfb   : > { %534 = vadd.xlane.f32.xlu0 %v533_v19 }
 0x184   : > { %v523_v21 = vpop.xlane.xlu0 %522 }
 0x185   : > { %v524_v22 = vadd.f32 %v523_v21, %v517_v20 }
 0x187   : > { %526 = vst.msk [vmem:[%s1703_s10] sm:$0xf] %vm525_vm5, %v524_v22 }
 0x188   : > { %v535_v36 = vpop.xlane.xlu0 %534 }
 0x189   : > { %v536_v37 = vadd.f32 %v1149_v35, %v535_v36 }
 0x18b   : > { %1150 = vst.msk [vmem:[%s1703_s10 + $0x4] sm:$0xf] %vm525_vm5, %v536_v37 }
 0x1c8   : > { %v582_v23 = vpop.f32.mrb[0].mxu0 }
 0x1c9   : > { %v607_v24 = vmul.f32 %v582_v23, %v582_v23  ;;  %v584_v25 = vpop.f32.mrb[1].mxu0 }
 0x1ca   : > { %v608_v26 = vmul.f32 %v584_v25, %v584_v25  ;;  %v586_v27 = vpop.f32.mrb[2].mxu0  ;;  %v593_v28 = vadd.f32 %v584_v25, %v582_v23 }
 0x1cb   : > { %v609_v29 = vmul.f32 %v586_v27, %v586_v27  ;;  %v588_v30 = vpop.f32.mrb[3].mxu0 }
 0x1cc   : > { %v596_v31 = vadd.f32 %v588_v30, %v586_v27  ;;  %v610_v32 = vmul.f32 %v588_v30, %v588_v30  ;;  %594 = vadd.xlane.f32.xlu1 %v593_v28  ;;  %v611_v33 = vadd.f32 %v608_v26, %v607_v24 }
 0x1ce   : > { %612 = vadd.xlane.f32.xlu0 %v611_v33  ;;  %v614_v34 = vadd.f32 %v610_v32, %v609_v29 }
 0x1d0   : > { %597 = vadd.xlane.f32.xlu1 %v596_v31 }
 0x1d4   : > { %615 = vadd.xlane.f32.xlu1 %v614_v34 }
 0x259   : > { %v595_v39 = vpop.xlane.xlu1 %594 }
 0x25a   : > { %v599_v41 = vadd.f32 %v595_v39, %v591_v38 }
 0x25b   : > { %v613_v42 = vpop.xlane.xlu0 %612 }
 0x25c   : > { %602 = vst.msk [vmem:[%s1706_s13] sm:$0xff] %vm601_vm6, %v599_v41  ;;  %v617_v44 = vadd.f32 %v1154_v40, %v613_v42 }
 0x25d   : > { %v598_v45 = vpop.xlane.xlu1 %597 }
 0x25e   : > { %1156 = vst.msk [vmem:[%s1706_s13 + $0x10] sm:$0xff] %vm601_vm6, %v617_v44  ;;  %v600_v46 = vadd.f32 %v598_v45, %v592_v43 }
 0x260   : > { %603 = vst.msk [vmem:[%s1706_s13 + $0x8] sm:$0xff] %vm601_vm6, %v600_v46 }
 0x261   : > { %v616_v48 = vpop.xlane.xlu1 %615 }
 0x262   : > { %v618_v49 = vadd.f32 %v1155_v47, %v616_v48 }
 0x264   : > { %1157 = vst.msk [vmem:[%s1706_s13 + $0x18] sm:$0xff] %vm601_vm6, %v618_v49 }
 0x265 PF: > { %p1158_p10 = scmp.lt.s32.totalorder %s1273_s26, 1 }
 0x266   : > { %v625_v50 = vld [vmem:[%s1703_s10] sm:$0xf] (!%p1158_p10)  ;;  %v1159_v51 = vld [vmem:[%s1703_s10 + $0x4] sm:$0xf] (!%p1158_p10)  ;;  %v1290_v52 = vmov (!%p1158_p10), 0   ;;  %s1291_s16 = smov (!%p1158_p10), 16  }
 0x267   : > { %624 = sbr.rel (%p1158_p10) target bundleno = 1820 (0x71c), region = 72  ;;  %1238 = vset.pattern.permute.xlu0 (!%p1158_p10), %v1290_v52  ;;  %v626_v53 = vmul.f32 (!%p1158_p10), 0.001953125, %v625_v50  ;;  %v629_v54 = vmul.f32 (!%p1158_p10), 0.001953125, %v1159_v51  ;;  %1239 = vset.pattern.permute.xlu1 (!%p1158_p10), %v1290_v52  ;;  %v650_v55 = vld [vmem:[%s1699_s6] sm:$0xf] (!%p1158_p10)  ;;  %s1292_s0 = smov (!%p1158_p10), 1  }
 0x268   : > { %653 = vperm.xlu1 (!%p1158_p10), %1239, %v650_v55   ;;  %919 = vmatprep.mubr.bf16.mxu0 (!%p1158_p10), %v1290_v52  ;;  %v634_v59 = vld [vmem:[%s1698_s5] sm:$0xf] (!%p1158_p10)  ;;  %s1293_s17 = smov (!%p1158_p10), 17   ;;  %s1294_s19 = smov (!%p1158_p10), 15   ;;  %vm861_vm12 = vcmask (!%p1158_p10), 1043456   ;;  %vm877_vm0 = vcmask (!%p1158_p10), 293888  }
 0x269   : > { %638 = vperm.xlu0 (!%p1158_p10), %1238, %v626_v53   ;;  %v630_v56 = vmul.f32 (!%p1158_p10), %v626_v53, %v626_v53  ;;  %s1295_s20 = smov (!%p1158_p10), 127   ;;  %s1296_s18 = smov (!%p1158_p10), 112   ;;  %v1160_v16 = vld [vmem:[%s1702_s9 + $0x1] ss:$8 sm:$0x3] (!%p1158_p10) }
 0x26a   : > { %s1297_s21 = smov (!%p1158_p10), 113   ;;  %s1298_s22 = smov (!%p1158_p10), 111   ;;  %v1162_v17 = vld [vmem:[%s1702_s9 + $0x3] ss:$8 sm:$0x3] (!%p1158_p10) }
 0x26b   : > { %v631_v57 = vsub.f32 (!%p1158_p10), %v629_v54, %v630_v56  ;;  %v669_v23 = vld [vmem:[%s1702_s9] ss:$8 sm:$0x3] (!%p1158_p10)  ;;  %v1161_v29 = vld [vmem:[%s1702_s9 + $0x2] ss:$8 sm:$0x3] (!%p1158_p10) }
 0x26c   : > { %v1163_v46 = vld [vmem:[%s1702_s9 + $0x5] ss:$8 sm:$0x3] (!%p1158_p10)  ;;  %p1169_p11 = scmp.ne.s32.totalorder (!%p1158_p10), %s1273_s26, 1 }
 0x26d   : > { %v632_v58 = vadd.f32 (!%p1158_p10), 1e-05, %v631_v57  ;;  %v1165_v57 = vld [vmem:[%s1702_s9 + $0x7] ss:$8 sm:$0x3] (!%p1158_p10) }
 0x26e   : > { %vm939_vm1 = vcmask (!%p1169_p11), 3072  }
 0x26f   : > { %1240 = vrsqrt.f32 %v632_v58 }
 0x279   : > { %v1241_v60 = vpop.eup %1240 }
 0x27a   : > { %v635_v61 = vmul.f32 %v1241_v60, %v634_v59 }
 0x27c   : > { %645 = vperm.xlu0 %1238, %v635_v61  }
 0x2e7   : > { %v654_v2 = vpop.permute.xlu1 %653 }
 0x2e8   : > { %v639_v62 = vpop.permute.xlu0 %638 }
 0x2e9   : > { %v641_v63 = vsub.f32 %v1448_v6, %v639_v62  ;;  %v642_v0 = vsub.f32 %v1450_v7, %v639_v62  ;;  %v664_v6 = vlaneseq }
 0x2eb   : > { %v672_v7 = vshrl.u32 %v664_v6, 7  ;;  %v1537_v11 = vand.u32 127, %v664_v6 }
 0x2ed   : > { %v1539_v14 = vsub.s32 0, %v672_v7  ;;  %v1541_v15 = vsub.s32 1, %v672_v7  ;;  %vm687_vm7 = vcmp.lt.s32.totalorder %v1537_v11, 16  ;;  %vm731_vm8 = vcmp.lt.s32.totalorder %v1537_v11, 1 }
 0x2ee   : > { %vm666_vm9 = vcmp.lt.s32.totalorder %v1537_v11, 17  ;;  %vm709_vm10 = vcmp.lt.s32.totalorder %v1537_v11, 15  ;;  %vm753_vm11 = vcmp.lt.s32.totalorder %v1537_v11, 127  ;;  %vm797_vm13 = vcmp.lt.s32.totalorder %v1537_v11, 112 }
 0x2ef   : > { %v696_v20 = vrot.slane %v1160_v16, %v1539_v14  ;;  %v700_v21 = vrot.slane %v1160_v16, %v1541_v15  ;;  %v740_v22 = vrot.slane %v1162_v17, %v1539_v14  ;;  %v744_v26 = vrot.slane %v1162_v17, %v1541_v15 }
 0x2f0   : > { %v674_v31 = vrot.slane %v669_v23, %v1539_v14  ;;  %v678_v32 = vrot.slane %v669_v23, %v1541_v15  ;;  %v718_v40 = vrot.slane %v1161_v29, %v1539_v14  ;;  %v722_v41 = vrot.slane %v1161_v29, %v1541_v15 }
 0x2f1   : > { %v762_v55 = vrot.slane %v1163_v46, %v1539_v14  ;;  %v766_v56 = vrot.slane %v1163_v46, %v1541_v15  ;;  %vm775_vm14 = vcmp.lt.s32.totalorder %v1537_v11, 113  ;;  %vm819_vm15 = vcmp.lt.s32.totalorder %v1537_v11, 111  ;;  %v876_v46 = vld [vmem:[%s1695_s2] sm:$0x3] }
 0x2fb   : > { %v646_v1 = vpop.permute.xlu0 %645 }
 0x2fc   : > { %v648_v3 = vmul.f32 %v646_v1, %v641_v63  ;;  %v649_v4 = vmul.f32 %v646_v1, %v642_v0 }
 0x2fe   : > { %v656_v5 = vadd.f32 %v654_v2, %v648_v3  ;;  %v657_v8 = vadd.f32 %v654_v2, %v649_v4  ;;  %v806_v4 = vrot.slane %v1165_v57, %v1539_v14 }
 0x300   : > { %v1517_v9 = vmax.f32 %v656_v5, 0.0  ;;  %v1519_v10 = vmax.f32 %v657_v8, 0.0  ;;  %v810_v5 = vrot.slane %v1165_v57, %v1541_v15  ;;  %v1164_v8 = vld [vmem:[%s1702_s9 + $0x6] ss:$8 sm:$0x3] }
 0x302   : > { %685 = vrot.lane.b32.xlu0 %v1519_v10, %s1291_s16  ;;  %683 = vrot.lane.b32.xlu1 %v1517_v9, %s1291_s16 }
 0x306   : > { %729 = vrot.lane.b32.xlu0 %v1519_v10, %s1292_s0  ;;  %727 = vrot.lane.b32.xlu1 %v1517_v9, %s1292_s0 }
 0x30a   : > { %662 = vrot.lane.b32.xlu0 %v1519_v10, %s1293_s17  ;;  %660 = vrot.lane.b32.xlu1 %v1517_v9, %s1293_s17 }
 0x30e   : > { %707 = vrot.lane.b32.xlu0 %v1519_v10, %s1294_s19  ;;  %705 = vrot.lane.b32.xlu1 %v1517_v9, %s1294_s19 }
 0x312   : > { %751 = vrot.lane.b32.xlu0 %v1519_v10, %s1295_s20  ;;  %749 = vrot.lane.b32.xlu1 %v1517_v9, %s1295_s20 }
 0x316   : > { %795 = vrot.lane.b32.xlu0 %v1519_v10, %s1296_s18  ;;  %793 = vrot.lane.b32.xlu1 %v1517_v9, %s1296_s18 }
 0x31a   : > { %773 = vrot.lane.b32.xlu0 %v1519_v10, %s1297_s21  ;;  %771 = vrot.lane.b32.xlu1 %v1517_v9, %s1297_s21 }
 0x31e   : > { %817 = vrot.lane.b32.xlu0 %v1519_v10, %s1298_s22  ;;  %815 = vrot.lane.b32.xlu1 %v1517_v9, %s1298_s22 }
 0x374   : > { %v686_v12 = vpop.permute.xlu0 %685  ;;  %v684_v13 = vpop.permute.xlu1 %683 }
 0x375   : > { %v688_v24 = vsel %vm687_vm7, %v684_v13, %v686_v12  ;;  %v689_v25 = vsel %vm687_vm7, %v686_v12, %v684_v13 }
 0x376   : > { %v703_v34 = vmul.f32 %v696_v20, %v689_v25  ;;  %v704_v35 = vmul.f32 %v700_v21, %v688_v24  ;;  %v784_v20 = vrot.slane %v1164_v8, %v1539_v14  ;;  %v788_v21 = vrot.slane %v1164_v8, %v1541_v15 }
 0x378   : > { %v730_v18 = vpop.permute.xlu0 %729  ;;  %v728_v19 = vpop.permute.xlu1 %727  ;;  %v839_v47 = vrot.slane %v703_v34, 4  ;;  %v840_v48 = vrot.slane %v704_v35, 4 }
 0x379   : > { %v732_v27 = vsel %vm731_vm8, %v728_v19, %v730_v18  ;;  %v733_v28 = vsel %vm731_vm8, %v730_v18, %v728_v19 }
 0x37a   : > { %v747_v38 = vmul.f32 %v740_v22, %v733_v28  ;;  %v748_v39 = vmul.f32 %v744_v26, %v732_v27  ;;  %v1166_v22 = vld [vmem:[%s1702_s9 + $0x10] ss:$8 sm:$0x3] }
 0x37b   : > { %v832_v29 = vrot.slane %v1166_v22, %v1541_v15 }
 0x37c   : > { %v663_v30 = vpop.permute.xlu0 %662  ;;  %v661_v33 = vpop.permute.xlu1 %660  ;;  %v845_v51 = vrot.slane %v747_v38, 4  ;;  %v846_v52 = vrot.slane %v748_v39, 4 }
 0x37d   : > { %v667_v36 = vsel %vm666_vm9, %v661_v33, %v663_v30  ;;  %v668_v37 = vsel %vm666_vm9, %v663_v30, %v661_v33  ;;  %v828_v30 = vrot.slane %v1166_v22, %v1539_v14 }
 0x37e   : > { %v681_v42 = vmul.f32 %v674_v31, %v668_v37  ;;  %v682_v43 = vmul.f32 %v678_v32, %v667_v36 }
 0x380   : > { %v708_v44 = vpop.permute.xlu0 %707  ;;  %v706_v45 = vpop.permute.xlu1 %705  ;;  %v863_v60 = vsel %vm861_vm12, %v682_v43, %v840_v48  ;;  %v862_v62 = vsel %vm861_vm12, %v681_v42, %v839_v47 }
 0x381   : > { %v710_v49 = vsel %vm709_vm10, %v706_v45, %v708_v44  ;;  %v711_v50 = vsel %vm709_vm10, %v708_v44, %v706_v45 }
 0x382   : > { %v725_v53 = vmul.f32 %v718_v40, %v711_v50  ;;  %v726_v54 = vmul.f32 %v722_v41, %v710_v49 }
 0x384   : > { %v752_v58 = vpop.permute.xlu0 %751  ;;  %v750_v59 = vpop.permute.xlu1 %749  ;;  %v865_v61 = vsel %vm861_vm12, %v726_v54, %v846_v52  ;;  %v864_v63 = vsel %vm861_vm12, %v725_v53, %v845_v51 }
 0x385   : > { %v754_v0 = vsel %vm753_vm11, %v750_v59, %v752_v58  ;;  %v755_v1 = vsel %vm753_vm11, %v752_v58, %v750_v59  ;;  %v871_v2 = vpack.c.bf16 %v865_v61, %v863_v60  ;;  %v870_v3 = vpack.c.bf16 %v864_v63, %v862_v62  ;;  %v932_v58 = vld [vmem:[%s1704_s11] sm:$0xf] (!%p1169_p11)  ;;  %v1170_v61 = vld [vmem:[%s1704_s11 + $0x4] sm:$0xf] (!%p1169_p11) }
 0x386   : > { %v769_v6 = vmul.f32 %v762_v55, %v754_v0  ;;  %v770_v7 = vmul.f32 %v766_v56, %v755_v1 }
 0x387   : > { %887 = vmatprep.subr.bf16.mxu0 %v871_v2 }
 0x388   : > { %v796_v12 = vpop.permute.xlu0 %795  ;;  %888 = vmatpush1.bf16.msra.mxu0 %v870_v3  ;;  %v794_v13 = vpop.permute.xlu1 %793  ;;  %v851_v23 = vrot.slane %v769_v6, 4  ;;  %v852_v24 = vrot.slane %v770_v7, 4 }
 0x389   : > { %v798_v16 = vsel %vm797_vm13, %v794_v13, %v796_v12  ;;  %v799_v17 = vsel %vm797_vm13, %v796_v12, %v794_v13 }
 0x38a   : > { %v813_v18 = vmul.f32 %v806_v4, %v798_v16  ;;  %v814_v19 = vmul.f32 %v810_v5, %v799_v17  ;;  %v867_v37 = vsel %vm861_vm12, %v1519_v10, %v852_v24  ;;  %v866_v39 = vsel %vm861_vm12, %v1517_v9, %v851_v23 }
 0x38c   : > { %v774_v25 = vpop.permute.xlu0 %773  ;;  %v772_v26 = vpop.permute.xlu1 %771  ;;  %v857_v31 = vrot.slane %v813_v18, 4  ;;  %v858_v32 = vrot.slane %v814_v19, 4 }
 0x38d   : > { %v776_v27 = vsel %vm775_vm14, %v772_v26, %v774_v25  ;;  %v777_v28 = vsel %vm775_vm14, %v774_v25, %v772_v26 }
 0x38e   : > { %v791_v33 = vmul.f32 %v784_v20, %v776_v27  ;;  %v792_v34 = vmul.f32 %v788_v21, %v777_v28 }
 0x390   : > { %v818_v35 = vpop.permute.xlu0 %817  ;;  %v816_v36 = vpop.permute.xlu1 %815  ;;  %v869_v38 = vsel %vm861_vm12, %v792_v34, %v858_v32  ;;  %v868_v40 = vsel %vm861_vm12, %v791_v33, %v857_v31 }
 0x391   : > { %v820_v15 = vsel %vm819_vm15, %v816_v36, %v818_v35  ;;  %v821_v14 = vsel %vm819_vm15, %v818_v35, %v816_v36  ;;  %v873_v41 = vpack.c.bf16 %v869_v38, %v867_v37  ;;  %v872_v42 = vpack.c.bf16 %v868_v40, %v866_v39 }
 0x392   : > { %v836_v43 = vmul.f32 %v832_v29, %v821_v14  ;;  %v835_v44 = vmul.f32 %v828_v30, %v820_v15 }
 0x393   : > { %889 = vmatprep.subr.bf16.mxu0 %v873_v41 }
 0x394   : > { %v875_v45 = vpack.c.bf16 %v836_v43, %v836_v43  ;;  %890 = vmatpush1.bf16.msra.mxu0 %v872_v42  ;;  %v874_v10 = vpack.c.bf16 %v835_v44, %v835_v44 }
 0x396   : > { %1167 = vmatprep.subr.msk.bf16.mxu0 %vm466_vm2, %v875_v45  ;;  %v882_v9 = vsel %vm466_vm2, %v874_v10, 0 }
 0x398   : > { %892 = vmatpush1.bf16.msra.mxu0 %v882_v9 }
 0x39b   : > { %1168 = vmatmul.mubr.msk.bf16.vlgmr.msra.gmra.mrb[0].mxu0 %vm877_vm0, %v876_v46 }
 0x46b   : > { %931 = sbr.rel (%p1169_p11) target bundleno = 1288 (0x508), region = 76 }
 0x46e   : > { %v921_v11 = vpop.f32.mrb[0].mxu0 }
 0x46f   : > { %v923_v47 = vpop.f32.mrb[1].mxu0  ;;  %v933_v50 = vsel (!%p1169_p11), %vm861_vm12, %v921_v11, 0.0  ;;  %v943_v52 = vmul.f32 (!%p1169_p11), %v921_v11, %v921_v11 }
 0x470   : > { %v925_v48 = vpop.f32.mrb[2].mxu0  ;;  %v934_v51 = vsel (!%p1169_p11), %vm861_vm12, %v923_v47, 0.0  ;;  %v944_v53 = vmul.f32 (!%p1169_p11), %v923_v47, %v923_v47 }
 0x471   : > { %v926_v49 = vpop.f32.mrb[3].mxu0  ;;  %v935_v54 = vadd.f32 (!%p1169_p11), %v934_v51, %v933_v50  ;;  %v945_v55 = vsel (!%p1169_p11), %vm861_vm12, %v943_v52, 0.0 }
 0x472   : > { %v946_v56 = vsel %vm861_vm12, %v944_v53, 0.0 }
 0x473   : > { %936 = vadd.xlane.f32.xlu0 %v935_v54  ;;  %v947_v57 = vadd.f32 %v946_v56, %v945_v55 }
 0x477   : > { %948 = vadd.xlane.f32.xlu0 %v947_v57 }
 0x500   : > { %v937_v59 = vpop.xlane.xlu0 %936 }
 0x501   : > { %v938_v60 = vadd.f32 %v937_v59, %v932_v58 }
 0x503   : > { %940 = vst.msk [vmem:[%s1704_s11] sm:$0xf] %vm939_vm1, %v938_v60 }
 0x504   : > { %v949_v62 = vpop.xlane.xlu0 %948 }
 0x505   : > { %v950_v63 = vadd.f32 %v1170_v61, %v949_v62 }
 0x507   : > { %1171 = vst.msk [vmem:[%s1704_s11 + $0x4] sm:$0xf] %vm939_vm1, %v950_v63 }
 0x508 PF: > { %p1172_p12 = scmp.ne.s32.totalorder %s1273_s26, 2 }
 0x509   : > { %v1299_v2 = vmov (!%p1172_p12), 0   ;;  %v981_v5 = vld [vmem:[%s1701_s8] sm:$0xf] (!%p1172_p12)  ;;  %v1053_v44 = vld [vmem:[%s1705_s12 + $0x8] sm:$0xff] (!%p1172_p12)  ;;  %v1178_v9 = vld [vmem:[%s1705_s12 + $0x18] sm:$0xff] (!%p1172_p12) }
 0x50a   : > { %955 = sbr.rel (%p1172_p12) target bundleno = 1820 (0x71c), region = 80  ;;  %v956_v0 = vld [vmem:[%s1704_s11] sm:$0xf] (!%p1172_p12)  ;;  %1242 = vset.pattern.permute.xlu0 (!%p1172_p12), %v1299_v2  ;;  %1243 = vset.pattern.permute.xlu1 (!%p1172_p12), %v1299_v2 }
 0x50b   : > { %v957_v3 = vmul.f32 (!%p1172_p12), 0.001953125, %v956_v0  ;;  %984 = vperm.xlu1 (!%p1172_p12), %1243, %v981_v5   ;;  %1041 = vmatprep.mubr.bf16.mxu0 (!%p1172_p12), %v1299_v2  ;;  %v965_v12 = vld [vmem:[%s1700_s7] sm:$0xf] (!%p1172_p12) }
 0x50c   : > { %v1244_v31 = vld [vmem:[%s1696_s3] sm:$0xff] (!%p1172_p12)  }
 0x50d   : > { %969 = vperm.xlu0 (!%p1172_p12), %1242, %v957_v3   ;;  %v961_v8 = vmul.f32 (!%p1172_p12), %v957_v3, %v957_v3  ;;  %v1052_v42 = vld [vmem:[%s1705_s12] sm:$0xff] (!%p1172_p12) }
 0x50e   : > { %v1173_v1 = vld [vmem:[%s1704_s11 + $0x4] sm:$0xf] (!%p1172_p12) }
 0x50f   : > { %v960_v4 = vmul.f32 (!%p1172_p12), 0.001953125, %v1173_v1 }
 0x511   : > { %v962_v6 = vsub.f32 %v960_v4, %v961_v8 }
 0x513   : > { %v963_v7 = vadd.f32 1e-05, %v962_v6 }
 0x515   : > { %1245 = vrsqrt.f32 %v963_v7 }
 0x51f   : > { %v1246_v13 = vpop.eup %1245 }
 0x520   : > { %v966_v16 = vmul.f32 %v1246_v13, %v965_v12 }
 0x522   : > { %976 = vperm.xlu0 %1242, %v966_v16  }
 0x58a   : > { %v985_v21 = vpop.permute.xlu1 %984 }
 0x58c   : > { %v970_v17 = vpop.permute.xlu0 %969 }
 0x58d   : > { %v972_v18 = vsub.f32 %v921_v11, %v970_v17  ;;  %v973_v19 = vsub.f32 %v923_v47, %v970_v17  ;;  %v1177_v47 = vld [vmem:[%s1705_s12 + $0x10] sm:$0xff] }
 0x5a1   : > { %v977_v20 = vpop.permute.xlu0 %976 }
 0x5a2   : > { %v979_v22 = vmul.f32 %v977_v20, %v972_v18  ;;  %v980_v23 = vmul.f32 %v977_v20, %v973_v19 }
 0x5a4   : > { %v987_v24 = vadd.f32 %v985_v21, %v979_v22  ;;  %v988_v25 = vadd.f32 %v985_v21, %v980_v23 }
 0x5a6   : > { %v990_v26 = vmax.f32 %v988_v25, 0.0  ;;  %v989_v27 = vmax.f32 %v987_v24, 0.0 }
 0x5a8   : > { %v994_v28 = vpack.c.bf16 %v990_v26, %v990_v26  ;;  %v993_v29 = vpack.c.bf16 %v989_v27, %v989_v27 }
 0x5aa   : > { %1175 = vmatprep.subr.msk.bf16.mxu0 %vm466_vm2, %v994_v28  ;;  %v1004_v30 = vsel %vm466_vm2, %v993_v29, 0  ;;  %vm1062_vm2 = vcmask 7168  }
 0x5ab   : > { %1010 = vmatpush1.bf16.msra.mxu0 %v1004_v30 }
 0x5ae   : > { %1176 = vmatmul.mubr.msk.bf16.vlgmr.msra.gmra.mrb[0].mxu0 %vm462_vm3, %v1244_v31 }
 0x681   : > { %v1043_v32 = vpop.f32.mrb[0].mxu0 }
 0x682   : > { %v1068_v33 = vmul.f32 %v1043_v32, %v1043_v32  ;;  %v1045_v34 = vpop.f32.mrb[1].mxu0 }
 0x683   : > { %v1069_v35 = vmul.f32 %v1045_v34, %v1045_v34  ;;  %v1047_v36 = vpop.f32.mrb[2].mxu0  ;;  %v1054_v37 = vadd.f32 %v1045_v34, %v1043_v32 }
 0x684   : > { %v1070_v38 = vmul.f32 %v1047_v36, %v1047_v36  ;;  %v1049_v39 = vpop.f32.mrb[3].mxu0 }
 0x685   : > { %v1057_v40 = vadd.f32 %v1049_v39, %v1047_v36  ;;  %v1071_v15 = vmul.f32 %v1049_v39, %v1049_v39  ;;  %1055 = vadd.xlane.f32.xlu1 %v1054_v37  ;;  %v1072_v14 = vadd.f32 %v1069_v35, %v1068_v33 }
 0x687   : > { %1058 = vadd.xlane.f32.xlu0 %v1057_v40  ;;  %v1075_v41 = vadd.f32 %v1071_v15, %v1070_v38 }
 0x689   : > { %1076 = vadd.xlane.f32.xlu1 %v1075_v41 }
 0x68b   : > { %1073 = vadd.xlane.f32.xlu0 %v1072_v14 }
 0x712   : > { %v1056_v43 = vpop.xlane.xlu1 %1055 }
 0x713   : > { %v1060_v45 = vadd.f32 %v1056_v43, %v1052_v42 }
 0x714   : > { %v1059_v10 = vpop.xlane.xlu0 %1058 }
 0x715   : > { %1063 = vst.msk [vmem:[%s1705_s12] sm:$0xff] %vm1062_vm2, %v1060_v45  ;;  %v1061_v46 = vadd.f32 %v1059_v10, %v1053_v44 }
 0x716   : > { %v1077_v11 = vpop.xlane.xlu1 %1076 }
 0x717   : > { %1064 = vst.msk [vmem:[%s1705_s12 + $0x8] sm:$0xff] %vm1062_vm2, %v1061_v46  ;;  %v1079_v48 = vadd.f32 %v1178_v9, %v1077_v11 }
 0x718   : > { %v1074_v49 = vpop.xlane.xlu0 %1073 }
 0x719   : > { %1180 = vst.msk [vmem:[%s1705_s12 + $0x18] sm:$0xff] %vm1062_vm2, %v1079_v48  ;;  %v1078_v50 = vadd.f32 %v1177_v47, %v1074_v49 }
 0x71b   : > { %1179 = vst.msk [vmem:[%s1705_s12 + $0x10] sm:$0xff] %vm1062_vm2, %v1078_v50 }
 0x71c PF: > { %s24_s29 = sadd.s32 1, %s1285_s29   ;;  %s1710_s21 = sld [smem:[#allocation2_spill]] }
 0x71d   : > { %p21_p13 = scmp.ge.s32.totalorder %s24_s29, 8   ;;  %s1711_s25 = smov %s1277_s27 }
 0x71e   : > { %s1712_s26 = smov %s1281_s28  ;;  %s1713_s27 = smov %s1716_s30 }
 0x71f   :  { %23 = sbr.rel (!%p21_p13) target bundleno = 3 (0x3), region = 143 }
 0x722   : > { %s1714_s28 = smov %s1710_s21 }

</bundles_post_ra>
